<compile_context>
chip_gen: v5e
topology: v5e:2x2
jax: 0.10.0
libtpu: 0.0.40
codegen_flags: <defaults>
</compile_context>

<pallas_src>
import functools

import jax
import jax.numpy as jnp
from jax.experimental import pallas as pl
from jax.experimental.pallas import tpu as pltpu


def _round_up(n, m):
    return ((n + m - 1) // m) * m


def mlp_kernel(x_ref, w1_ref, b1_ref, w2_ref, b2_ref,
               w3_ref, b3_ref, w4_ref, b4_ref, o_ref):
    # Feature-major: x_ref is (in_pad, tile_b); each layer is W (out, in) @ h (in, tile_b).
    # bf16 operands on the MXU, f32 accumulation / bias / ReLU on the VPU (v5e-safe).
    h = x_ref[...].astype(jnp.bfloat16)                                  # (8, TB)

    h = jnp.dot(w1_ref[...], h, preferred_element_type=jnp.float32) + b1_ref[...]
    h = jnp.maximum(h, 0.0)                                              # (256, TB) f32

    h = jnp.dot(w2_ref[...], h.astype(jnp.bfloat16),
                preferred_element_type=jnp.float32) + b2_ref[...]
    h = jnp.maximum(h, 0.0)                                              # (128, TB)

    h = jnp.dot(w3_ref[...], h.astype(jnp.bfloat16),
                preferred_element_type=jnp.float32) + b3_ref[...]
    h = jnp.maximum(h, 0.0)                                              # (128, TB)

    h = jnp.dot(w4_ref[...], h.astype(jnp.bfloat16),
                preferred_element_type=jnp.float32) + b4_ref[...]
    h = jnp.maximum(h, 0.0)          # torch forward applies ReLU after fc4 as well

    o_ref[...] = h.astype(o_ref.dtype)                                   # (8, TB)


@functools.partial(jax.jit, static_argnames=("tile_b",))
def net_forward(x, params, *, tile_b=512):
    (w1, b1), (w2, b2), (w3, b3), (w4, b4) = params
    B, fin = x.shape                 # fin == 6
    in_pad = w1.shape[1]             # 8
    out_pad = w4.shape[0]            # 8

    # --- batch tiling: tile_b is the lane dim of every activation slab -> multiple of 128.
    bp_min = _round_up(B, 128)
    tb = max(128, (min(tile_b, bp_min) // 128) * 128)
    # Keep >= 2 grid steps when the batch allows it (megacore sharding on v7x).
    if bp_min >= 256 and _round_up(B, tb) // tb < 2:
        tb = min(tb, max(128, ((bp_min // 2) // 128) * 128))
    Bp = _round_up(B, tb)
    grid = (Bp // tb,)

    # Feature-major, zero-padded input slab (in_pad, Bp).  This transpose is tiny
    # (~56 B/row) compared with the 512 B/row padded-output slice it replaces.
    xT = jnp.zeros((in_pad, Bp), x.dtype).at[:fin, :B].set(x.T)

    x_spec = pl.BlockSpec((in_pad, tb), lambda i: (0, i))
    const_spec = lambda a: pl.BlockSpec(a.shape, lambda i: (0, 0))  # grid-invariant
    weight_args = (w1, b1, w2, b2, w3, b3, w4, b4)

    flops = 2 * Bp * (w1.shape[0] * w1.shape[1]
                      + w2.shape[0] * w2.shape[1]
                      + w3.shape[0] * w3.shape[1]
                      + w4.shape[0] * w4.shape[1])
    bytes_accessed = (xT.size * xT.dtype.itemsize
                      + sum(a.size * a.dtype.itemsize for a in weight_args)
                      + out_pad * Bp * 4)

    outT = pl.pallas_call(
        mlp_kernel,
        out_shape=jax.ShapeDtypeStruct((out_pad, Bp), jnp.float32),
        grid=grid,
        in_specs=[x_spec] + [const_spec(a) for a in weight_args],
        out_specs=pl.BlockSpec((out_pad, tb), lambda i: (0, i)),
        compiler_params=pltpu.CompilerParams(
            dimension_semantics=("parallel",)),
        cost_estimate=pl.CostEstimate(flops=flops,
                                      bytes_accessed=bytes_accessed,
                                      transcendentals=0),
    )(xT, *weight_args)

    # Un-pad + back to (batch, 4).  Reads only 8*Bp f32 (vs 128*Bp f32 previously).
    return outT[:4, :B].T


def init_params(key):
    """PyTorch nn.Linear-style init (uniform +-1/sqrt(fan_in)).

    Weights keep the torch state_dict layout (out, in) and are zero-padded to
    (out_pad, in_pad); biases become (out_pad, 1) columns.  Weights bf16 (MXU
    operands), biases f32.  A real state_dict maps in directly the same way."""
    true_dims = [(6, 200), (200, 100), (100, 50), (50, 4)]     # (in, out) per nn.Linear
    pad_in = [8, 256, 128, 128]
    pad_out = [256, 128, 128, 8]
    params = []
    for (fi, fo), pfi, pfo in zip(true_dims, pad_in, pad_out):
        key, kw, kb = jax.random.split(key, 3)
        bound = 1.0 / (fi ** 0.5)
        w = jax.random.uniform(kw, (fo, fi), jnp.float32, -bound, bound)   # torch (out, in)
        b = jax.random.uniform(kb, (fo,), jnp.float32, -bound, bound)
        wp = jnp.zeros((pfo, pfi), jnp.float32).at[:fo, :fi].set(w)
        bp = jnp.zeros((pfo, 1), jnp.float32).at[:fo, 0].set(b)
        params.append((wp.astype(jnp.bfloat16), bp))
    return params


if __name__ == "__main__":
    key = jax.random.PRNGKey(0)
    key, kx = jax.random.split(key)

    batch = 256                      # -> tile_b=128, 2 grid steps (exercises the pipeline)
    x = jax.random.normal(kx, (batch, 6), dtype=jnp.float32)
    params = init_params(key)

    out = net_forward(x, params)
    jax.block_until_ready(out)
    assert out.shape == (batch, 4)

    # Pure-JAX reference using the identical bf16-operand / f32-accumulate recipe
    # in the same feature-major layout.
    hT = jnp.zeros((8, batch), jnp.float32).at[:6, :].set(x.T)
    for (w, b) in params:
        hT = jnp.maximum(
            jnp.dot(w, hT.astype(jnp.bfloat16),
                    preferred_element_type=jnp.float32) + b, 0.0)
    ref = hT[:4, :].T
    assert jnp.allclose(out, ref, atol=1e-4, rtol=1e-4), (
        float(jnp.max(jnp.abs(out - ref))))

    print("KERNEL_OK")
</pallas_src>

<mosaic_0001>
module attributes {stable_mosaic.version = 11 : i64} {
  func.func @mlp_kernel(%arg0: i32, %arg1: memref<8x128xf32, #tpu.memory_space<vmem>>, %arg2: memref<256x8xbf16, #tpu.memory_space<vmem>>, %arg3: memref<256x1xf32, #tpu.memory_space<vmem>>, %arg4: memref<128x256xbf16, #tpu.memory_space<vmem>>, %arg5: memref<128x1xf32, #tpu.memory_space<vmem>>, %arg6: memref<128x128xbf16, #tpu.memory_space<vmem>>, %arg7: memref<128x1xf32, #tpu.memory_space<vmem>>, %arg8: memref<8x128xbf16, #tpu.memory_space<vmem>>, %arg9: memref<8x1xf32, #tpu.memory_space<vmem>>, %arg10: memref<8x128xf32, #tpu.memory_space<vmem>>) attributes {dimension_semantics = [#tpu.dimension_semantics<parallel>], iteration_bounds = array<i64: 2>, scalar_prefetch = 0 : i64, scratch_operands = 0 : i64, tpu.core_type = #tpu.core_type<tc>, window_params = [{transform_indices = @transform_0, window_bounds = array<i64: 8, 128>}, {pipeline_mode = #tpu.pipeline_mode<synchronous>, transform_indices = @transform_1, window_bounds = array<i64: 256, 8>}, {pipeline_mode = #tpu.pipeline_mode<synchronous>, transform_indices = @transform_2, window_bounds = array<i64: 256, 1>}, {pipeline_mode = #tpu.pipeline_mode<synchronous>, transform_indices = @transform_3, window_bounds = array<i64: 128, 256>}, {pipeline_mode = #tpu.pipeline_mode<synchronous>, transform_indices = @transform_4, window_bounds = array<i64: 128, 1>}, {pipeline_mode = #tpu.pipeline_mode<synchronous>, transform_indices = @transform_5, window_bounds = array<i64: 128, 128>}, {pipeline_mode = #tpu.pipeline_mode<synchronous>, transform_indices = @transform_6, window_bounds = array<i64: 128, 1>}, {pipeline_mode = #tpu.pipeline_mode<synchronous>, transform_indices = @transform_7, window_bounds = array<i64: 8, 128>}, {pipeline_mode = #tpu.pipeline_mode<synchronous>, transform_indices = @transform_8, window_bounds = array<i64: 8, 1>}, {transform_indices = @transform_9, window_bounds = array<i64: 8, 128>}]} {
    %c0 = arith.constant 0 : index
    %c0_0 = arith.constant 0 : index
    %0 = vector.load %arg1[%c0, %c0_0] : memref<8x128xf32, #tpu.memory_space<vmem>>, vector<8x128xf32>
    %1 = arith.truncf %0 : vector<8x128xf32> to vector<8x128xbf16>
    %c0_1 = arith.constant 0 : index
    %c0_2 = arith.constant 0 : index
    %2 = vector.load %arg2[%c0_1, %c0_2] : memref<256x8xbf16, #tpu.memory_space<vmem>>, vector<256x8xbf16>
    %cst = arith.constant dense<0.000000e+00> : vector<256x128xf32>
    %3 = tpu.matmul %2, %1, %cst {dimension_numbers = #tpu.dot_dimension_numbers<[1], [0], [0], [1], [0, 0, 1, 1], [], []>} : vector<256x8xbf16>, vector<8x128xbf16>, vector<256x128xf32> -> vector<256x128xf32>
    %c0_3 = arith.constant 0 : index
    %c0_4 = arith.constant 0 : index
    %4 = vector.load %arg3[%c0_3, %c0_4] : memref<256x1xf32, #tpu.memory_space<vmem>>, vector<256x1xf32>
    %5 = vector.broadcast %4 : vector<256x1xf32> to vector<256x128xf32>
    %6 = arith.addf %3, %5 : vector<256x128xf32>
    %cst_5 = arith.constant 0.000000e+00 : f32
    %7 = vector.broadcast %cst_5 : f32 to vector<256x128xf32>
    %8 = arith.maximumf %6, %7 : vector<256x128xf32>
    %c0_6 = arith.constant 0 : index
    %c0_7 = arith.constant 0 : index
    %9 = vector.load %arg4[%c0_6, %c0_7] : memref<128x256xbf16, #tpu.memory_space<vmem>>, vector<128x256xbf16>
    %10 = arith.truncf %8 : vector<256x128xf32> to vector<256x128xbf16>
    %cst_8 = arith.constant dense<0.000000e+00> : vector<128x128xf32>
    %11 = tpu.matmul %9, %10, %cst_8 {dimension_numbers = #tpu.dot_dimension_numbers<[1], [0], [0], [1], [0, 0, 1, 1], [], []>} : vector<128x256xbf16>, vector<256x128xbf16>, vector<128x128xf32> -> vector<128x128xf32>
    %c0_9 = arith.constant 0 : index
    %c0_10 = arith.constant 0 : index
    %12 = vector.load %arg5[%c0_9, %c0_10] : memref<128x1xf32, #tpu.memory_space<vmem>>, vector<128x1xf32>
    %13 = vector.broadcast %12 : vector<128x1xf32> to vector<128x128xf32>
    %14 = arith.addf %11, %13 : vector<128x128xf32>
    %cst_11 = arith.constant 0.000000e+00 : f32
    %15 = vector.broadcast %cst_11 : f32 to vector<128x128xf32>
    %16 = arith.maximumf %14, %15 : vector<128x128xf32>
    %c0_12 = arith.constant 0 : index
    %c0_13 = arith.constant 0 : index
    %17 = vector.load %arg6[%c0_12, %c0_13] : memref<128x128xbf16, #tpu.memory_space<vmem>>, vector<128x128xbf16>
    %18 = arith.truncf %16 : vector<128x128xf32> to vector<128x128xbf16>
    %cst_14 = arith.constant dense<0.000000e+00> : vector<128x128xf32>
    %19 = tpu.matmul %17, %18, %cst_14 {dimension_numbers = #tpu.dot_dimension_numbers<[1], [0], [0], [1], [0, 0, 1, 1], [], []>} : vector<128x128xbf16>, vector<128x128xbf16>, vector<128x128xf32> -> vector<128x128xf32>
    %c0_15 = arith.constant 0 : index
    %c0_16 = arith.constant 0 : index
    %20 = vector.load %arg7[%c0_15, %c0_16] : memref<128x1xf32, #tpu.memory_space<vmem>>, vector<128x1xf32>
    %21 = vector.broadcast %20 : vector<128x1xf32> to vector<128x128xf32>
    %22 = arith.addf %19, %21 : vector<128x128xf32>
    %cst_17 = arith.constant 0.000000e+00 : f32
    %23 = vector.broadcast %cst_17 : f32 to vector<128x128xf32>
    %24 = arith.maximumf %22, %23 : vector<128x128xf32>
    %c0_18 = arith.constant 0 : index
    %c0_19 = arith.constant 0 : index
    %25 = vector.load %arg8[%c0_18, %c0_19] : memref<8x128xbf16, #tpu.memory_space<vmem>>, vector<8x128xbf16>
    %26 = arith.truncf %24 : vector<128x128xf32> to vector<128x128xbf16>
    %cst_20 = arith.constant dense<0.000000e+00> : vector<8x128xf32>
    %27 = tpu.matmul %25, %26, %cst_20 {dimension_numbers = #tpu.dot_dimension_numbers<[1], [0], [0], [1], [0, 0, 1, 1], [], []>} : vector<8x128xbf16>, vector<128x128xbf16>, vector<8x128xf32> -> vector<8x128xf32>
    %c0_21 = arith.constant 0 : index
    %c0_22 = arith.constant 0 : index
    %28 = vector.load %arg9[%c0_21, %c0_22] : memref<8x1xf32, #tpu.memory_space<vmem>>, vector<8x1xf32>
    %29 = vector.broadcast %28 : vector<8x1xf32> to vector<8x128xf32>
    %30 = arith.addf %27, %29 : vector<8x128xf32>
    %cst_23 = arith.constant 0.000000e+00 : f32
    %31 = vector.broadcast %cst_23 : f32 to vector<8x128xf32>
    %32 = arith.maximumf %30, %31 : vector<8x128xf32>
    %c0_24 = arith.constant 0 : index
    %c0_25 = arith.constant 0 : index
    %33 = vector.load %arg10[%c0_24, %c0_25] : memref<8x128xf32, #tpu.memory_space<vmem>>, vector<8x128xf32>
    tpu.vector_store %arg10[%c0_24, %c0_25], %32 {strides = array<i32>} : memref<8x128xf32, #tpu.memory_space<vmem>>, vector<8x128xf32>,
    return
  }
  func.func @transform_0(%arg0: i32) -> (i32, i32) {
    %c0_i32 = arith.constant 0 : i32
    %c0_i32_0 = arith.constant 0 : i32
    return %c0_i32, %arg0 : i32, i32
  }
  func.func @transform_1(%arg0: i32) -> (i32, i32) {
    %c0_i32 = arith.constant 0 : i32
    %c0_i32_0 = arith.constant 0 : i32
    %c0_i32_1 = arith.constant 0 : i32
    return %c0_i32, %c0_i32_0 : i32, i32
  }
  func.func @transform_2(%arg0: i32) -> (i32, i32) {
    %c0_i32 = arith.constant 0 : i32
    %c0_i32_0 = arith.constant 0 : i32
    %c0_i32_1 = arith.constant 0 : i32
    return %c0_i32, %c0_i32_0 : i32, i32
  }
  func.func @transform_3(%arg0: i32) -> (i32, i32) {
    %c0_i32 = arith.constant 0 : i32
    %c0_i32_0 = arith.constant 0 : i32
    %c0_i32_1 = arith.constant 0 : i32
    return %c0_i32, %c0_i32_0 : i32, i32
  }
  func.func @transform_4(%arg0: i32) -> (i32, i32) {
    %c0_i32 = arith.constant 0 : i32
    %c0_i32_0 = arith.constant 0 : i32
    %c0_i32_1 = arith.constant 0 : i32
    return %c0_i32, %c0_i32_0 : i32, i32
  }
  func.func @transform_5(%arg0: i32) -> (i32, i32) {
    %c0_i32 = arith.constant 0 : i32
    %c0_i32_0 = arith.constant 0 : i32
    %c0_i32_1 = arith.constant 0 : i32
    return %c0_i32, %c0_i32_0 : i32, i32
  }
  func.func @transform_6(%arg0: i32) -> (i32, i32) {
    %c0_i32 = arith.constant 0 : i32
    %c0_i32_0 = arith.constant 0 : i32
    %c0_i32_1 = arith.constant 0 : i32
    return %c0_i32, %c0_i32_0 : i32, i32
  }
  func.func @transform_7(%arg0: i32) -> (i32, i32) {
    %c0_i32 = arith.constant 0 : i32
    %c0_i32_0 = arith.constant 0 : i32
    %c0_i32_1 = arith.constant 0 : i32
    return %c0_i32, %c0_i32_0 : i32, i32
  }
  func.func @transform_8(%arg0: i32) -> (i32, i32) {
    %c0_i32 = arith.constant 0 : i32
    %c0_i32_0 = arith.constant 0 : i32
    %c0_i32_1 = arith.constant 0 : i32
    return %c0_i32, %c0_i32_0 : i32, i32
  }
  func.func @transform_9(%arg0: i32) -> (i32, i32) {
    %c0_i32 = arith.constant 0 : i32
    %c0_i32_0 = arith.constant 0 : i32
    return %c0_i32, %arg0 : i32, i32
  }
}

</mosaic_0001>

<bundles_post_ra>
// kernel: net_forward.1
= control target key start
LH: loop header
LB: loop body
LE: loop exit
PB: predicated region body
PF: predicated region fallthrough
CT: control target
= control target key end

     0   :  { %s1744_s30 = smov 0   ;;  %s2270_s0 = inlined_call_operand.vmem [shape: f32[8,256], index: 0, kind: input, shape index: {}]   ;;  %s2271_s1 = inlined_call_operand.vmem [shape: bf16[256,8], index: 1, kind: input, shape index: {}]   ;;  %s2272_s2 = inlined_call_operand.vmem [shape: f32[256,1], index: 2, kind: input, shape index: {}]   ;;  %s2273_s3 = inlined_call_operand.vmem [shape: bf16[128,256], index: 3, kind: input, shape index: {}]   ;;  %s2274_s4 = inlined_call_operand.vmem [shape: f32[128,1], index: 4, kind: input, shape index: {}]   ;;  %s2275_s5 = inlined_call_operand.vmem [shape: bf16[128,128], index: 5, kind: input, shape index: {}]   ;;  %s2276_s6 = inlined_call_operand.vmem [shape: f32[128,1], index: 6, kind: input, shape index: {}]   ;;  %s2277_s7 = inlined_call_operand.vmem [shape: bf16[8,128], index: 7, kind: input, shape index: {}]   ;;  %s2278_s8 = inlined_call_operand.vmem [shape: f32[8,1], index: 8, kind: input, shape index: {}]   ;;  %s2279_s9 = inlined_call_operand.vmem [shape: f32[8,256], index: 9, kind: output, shape index: {}]  }
   0x1 LB: > { %s1447_s10 = sadd.s32 4294967295, %s1691_s30   ;;  %p1451_p0 = scmp.ge.s32.totalorder %s1691_s30, 1  ;;  %s1691_s30 = sphi %s1744_s30, %s19_s30  }
   0x2   : > { %p286_p1 = scmp.lt.s32.totalorder %s1691_s30, 3 }
   0x4   : > { %p287_p2 = pnand %p1451_p0, %p286_p1 }
   0x5   : > { %p320_p3 = scmp.lt.s32.totalorder (!%p287_p2), %s1447_s10, 1 }
   0x6   : > { %290 = sbr.rel (%p287_p2) target bundleno = 1064 (0x428), region = 56 }
   0xb   : > { %v393_v0 = vld [vmem:[%s2272_s2 + $0xf0] sm:$0xff]  ;;  %v391_v1 = vld [vmem:[%s2272_s2 + $0xe0] sm:$0xff]  ;;  %v1693_v3 = vmov 0   ;;  %s2281_s10 = smov (!%p320_p3, %s1447_s10), 1  ;;  %vm684_vm0 = vcmask 1043456   ;;  %v392_v5 = vld [vmem:[%s2272_s2 + $0xe8] sm:$0xff] }
   0xc   : > { %v377_v2 = vld [vmem:[%s2272_s2 + $0x70] sm:$0xff]  ;;  %1684 = vset.pattern.permute.xlu2 %v1693_v3  ;;  %1683 = vset.pattern.permute.xlu1 %v1693_v3  ;;  %s1452_s17 = sshll.u32 %s2281_s10, 3  ;;  %v394_v7 = vld [vmem:[%s2272_s2 + $0xf8] sm:$0xff]  ;;  %v1632_v10 = vld [vmem:[%s2271_s1] sm:$0xff]  ;;  %vm635_vm1 = vcmask 64512  }
   0xd   : > { %1682 = vset.pattern.permute.xlu0 %v1693_v3  ;;  %537 = vperm.xlu2 %1684, %v391_v1   ;;  %s323_s20 = scalar_lea.vmem %s2270_s0, %s1452_s17  ;;  %v378_v8 = vld [vmem:[%s2272_s2 + $0x78] sm:$0xff]  ;;  %v389_v11 = vld [vmem:[%s2272_s2 + $0xd0] sm:$0xff]  ;;  %v376_v12 = vld [vmem:[%s2272_s2 + $0x68] sm:$0xff]  ;;  %s327_s27 = scalar_lea.vmem %s2279_s9, %s1452_s17 }
   0xe   : > { %547 = vperm.xlu0 %1682, %v393_v0   ;;  %467 = vperm.xlu1 %1683, %v377_v2   ;;  %v329_v4 = vld [vmem:[%s323_s20] sm:$0xff]  ;;  %v374_v15 = vld [vmem:[%s2272_s2 + $0x58] sm:$0xff]  ;;  %v373_v17 = vld [vmem:[%s2272_s2 + $0x50] sm:$0xff] }
   0xf   : > { %v330_v6 = vpack.c.bf16 %v329_v4, %v329_v4  ;;  %v375_v13 = vld [vmem:[%s2272_s2 + $0x60] sm:$0xff]  ;;  %v390_v16 = vld [vmem:[%s2272_s2 + $0xd8] sm:$0xff]  ;;  %v1633_v18 = vld [vmem:[%s2271_s1 + $0x8] sm:$0xff] }
  0x10   : > { %v1644_v14 = vld [vmem:[%s2271_s1 + $0x60] sm:$0xff]  ;;  %v388_v21 = vld [vmem:[%s2272_s2 + $0xc8] sm:$0xff]  ;;  %v386_v23 = vld [vmem:[%s2272_s2 + $0xb8] sm:$0xff] }
  0x11   : > { %v686_v9 = vsel %vm684_vm0, %v330_v6, 0  ;;  %v371_v19 = vld [vmem:[%s2272_s2 + $0x40] sm:$0xff]  ;;  %v1645_v22 = vld [vmem:[%s2271_s1 + $0x68] sm:$0xff]  ;;  %v385_v24 = vld [vmem:[%s2272_s2 + $0xb0] sm:$0xff] }
  0x12   : > { %695 = vmatpush.bf16.msra.mxu0 %v686_v9  ;;  %1672 = vmatpush.bf16.msra.mxu2 %v686_v9  ;;  %v387_v20 = vld [vmem:[%s2272_s2 + $0xc0] sm:$0xff]  ;;  %v372_v25 = vld [vmem:[%s2272_s2 + $0x48] sm:$0xff]  ;;  %v1634_v26 = vld [vmem:[%s2271_s1 + $0x10] sm:$0xff] }
  0x13   : > { %v383_v27 = vld [vmem:[%s2272_s2 + $0xa0] sm:$0xff]  ;;  %v370_v28 = vld [vmem:[%s2272_s2 + $0x38] sm:$0xff]  ;;  %v369_v29 = vld [vmem:[%s2272_s2 + $0x30] sm:$0xff] }
  0x14   : > { %v1646_v30 = vld [vmem:[%s2271_s1 + $0x70] sm:$0xff]  ;;  %v368_v31 = vld [vmem:[%s2272_s2 + $0x28] sm:$0xff]  ;;  %v367_v33 = vld [vmem:[%s2272_s2 + $0x20] sm:$0xff] }
  0x15   : > { %542 = vperm.xlu2 %1684, %v392_v5   ;;  %1518 = vmatmul.msk.bf16.vlgmr.msra.gmra.mxu0 %vm635_vm1, %v1632_v10  ;;  %v384_v32 = vld [vmem:[%s2272_s2 + $0xa8] sm:$0xff]  ;;  %v1635_v34 = vld [vmem:[%s2271_s1 + $0x18] sm:$0xff]  ;;  %v365_v35 = vld [vmem:[%s2272_s2 + $0x10] sm:$0xff] }
  0x16   : > { %552 = vperm.xlu0 %1682, %v394_v7   ;;  %472 = vperm.xlu1 %1683, %v378_v8   ;;  %v381_v36 = vld [vmem:[%s2272_s2 + $0x90] sm:$0xff]  ;;  %v382_v37 = vld [vmem:[%s2272_s2 + $0x98] sm:$0xff]  ;;  %v380_v39 = vld [vmem:[%s2272_s2 + $0x88] sm:$0xff] }
  0x17   : > { %1530 = vmatmul.msk.bf16.vlgmr.msra.gmra.mxu2 %vm635_vm1, %v1644_v14  ;;  %v1647_v38 = vld [vmem:[%s2271_s1 + $0x78] sm:$0xff]  ;;  %v379_v40 = vld [vmem:[%s2272_s2 + $0x80] sm:$0xff]  ;;  %v855_v43 = vld [vmem:[%s2274_s4 + $0x70] sm:$0xff] }
  0x18   : > { %v366_v41 = vld [vmem:[%s2272_s2 + $0x18] sm:$0xff]  ;;  %v1636_v42 = vld [vmem:[%s2271_s1 + $0x20] sm:$0xff]  ;;  %v364_v44 = vld [vmem:[%s2272_s2 + $0x8] sm:$0xff] }
  0x19   : > { %v363_v45 = vld [vmem:[%s2272_s2] sm:$0xff]  ;;  %v854_v46 = vld [vmem:[%s2274_s4 + $0x68] sm:$0xff]  ;;  %v856_v48 = vld [vmem:[%s2274_s4 + $0x78] sm:$0xff] }
  0x1a   : > { %v853_v47 = vld [vmem:[%s2274_s4 + $0x60] sm:$0xff]  ;;  %v1637_v49 = vld [vmem:[%s2271_s1 + $0x28] sm:$0xff]  ;;  %v852_v51 = vld [vmem:[%s2274_s4 + $0x58] sm:$0xff] }
  0x1b   : > { %v849_v50 = vld [vmem:[%s2274_s4 + $0x40] sm:$0xff]  ;;  %v851_v52 = vld [vmem:[%s2274_s4 + $0x50] sm:$0xff]  ;;  %v848_v53 = vld [vmem:[%s2274_s4 + $0x38] sm:$0xff] }
  0x1c   : > { %v847_v55 = vld [vmem:[%s2274_s4 + $0x30] sm:$0xff]  ;;  %v850_v56 = vld [vmem:[%s2274_s4 + $0x48] sm:$0xff]  ;;  %v845_v60 = vld [vmem:[%s2274_s4 + $0x20] sm:$0xff] }
  0x1d   : > { %527 = vperm.xlu2 %1684, %v389_v11   ;;  %v1638_v57 = vld [vmem:[%s2271_s1 + $0x30] sm:$0xff]  ;;  %v846_v59 = vld [vmem:[%s2274_s4 + $0x28] sm:$0xff]  ;;  %v841_v1 = vld [vmem:[%s2274_s4] sm:$0xff] }
  0x1e   : > { %462 = vperm.xlu1 %1683, %v376_v12   ;;  %457 = vperm.xlu0 %1682, %v375_v13   ;;  %v843_v58 = vld [vmem:[%s2274_s4 + $0x10] sm:$0xff]  ;;  %v842_v0 = vld [vmem:[%s2274_s4 + $0x8] sm:$0xff]  ;;  %v844_v2 = vld [vmem:[%s2274_s4 + $0x18] sm:$0xff] }
  0x1f   : > { %v1639_v3 = vld [vmem:[%s2271_s1 + $0x38] sm:$0xff]  ;;  %v1167_v7 = vld [vmem:[%s2276_s6 + $0x60] sm:$0xff]  ;;  %v1169_v9 = vld [vmem:[%s2276_s6 + $0x70] sm:$0xff] }
  0x20   : > { %v1170_v8 = vld [vmem:[%s2276_s6 + $0x78] sm:$0xff]  ;;  %v1165_v14 = vld [vmem:[%s2276_s6 + $0x50] sm:$0xff] }
  0x21   : > { %v1166_v13 = vld [vmem:[%s2276_s6 + $0x58] sm:$0xff] }
  0x25   : > { %452 = vperm.xlu2 %1684, %v374_v15   ;;  %1519 = vmatmul.msk.bf16.gmra.mxu0 %vm635_vm1, %v1633_v18  ;;  %v1168_v15 = vld [vmem:[%s2276_s6 + $0x68] sm:$0xff] }
  0x26   : > { %532 = vperm.xlu0 %1682, %v390_v16   ;;  %447 = vperm.xlu1 %1683, %v373_v17   ;;  %v1640_v16 = vld [vmem:[%s2271_s1 + $0x40] sm:$0xff] }
  0x27   : > { %1531 = vmatmul.msk.bf16.gmra.mxu2 %vm635_vm1, %v1645_v22  ;;  %v1164_v22 = vld [vmem:[%s2276_s6 + $0x48] sm:$0xff] }
  0x2d   : > { %437 = vperm.xlu2 %1684, %v371_v19  }
  0x2e   : > { %517 = vperm.xlu0 %1682, %v387_v20   ;;  %522 = vperm.xlu1 %1683, %v388_v21   ;;  %v1161_v20 = vld [vmem:[%s2276_s6 + $0x30] sm:$0xff] }
  0x35   : > { %512 = vperm.xlu2 %1684, %v386_v23   ;;  %1520 = vmatmul.msk.bf16.gmra.mxu0 %vm635_vm1, %v1634_v26  ;;  %v1163_v23 = vld [vmem:[%s2276_s6 + $0x40] sm:$0xff] }
  0x36   : > { %507 = vperm.xlu1 %1683, %v385_v24   ;;  %442 = vperm.xlu0 %1682, %v372_v25  }
  0x37   : > { %1532 = vmatmul.msk.bf16.gmra.mxu2 %vm635_vm1, %v1646_v30  ;;  %v1162_v30 = vld [vmem:[%s2276_s6 + $0x38] sm:$0xff] }
  0x3d   : > { %497 = vperm.xlu2 %1684, %v383_v27   ;;  %v1160_v27 = vld [vmem:[%s2276_s6 + $0x28] sm:$0xff] }
  0x3e   : > { %432 = vperm.xlu1 %1683, %v370_v28   ;;  %427 = vperm.xlu0 %1682, %v369_v29   ;;  %v1159_v29 = vld [vmem:[%s2276_s6 + $0x20] sm:$0xff] }
  0x45   : > { %422 = vperm.xlu2 %1684, %v368_v31   ;;  %1521 = vmatmul.msk.bf16.gmra.mxu0 %vm635_vm1, %v1635_v34  ;;  %v1641_v31 = vld [vmem:[%s2271_s1 + $0x48] sm:$0xff] }
  0x46   : > { %502 = vperm.xlu0 %1682, %v384_v32   ;;  %417 = vperm.xlu1 %1683, %v367_v33  }
  0x47   : > { %1533 = vmatmul.msk.bf16.gmra.mxu2 %vm635_vm1, %v1647_v38  ;;  %v1158_v38 = vld [vmem:[%s2276_s6 + $0x18] sm:$0xff] }
  0x4d   : > { %407 = vperm.xlu2 %1684, %v365_v35  }
  0x4e   : > { %487 = vperm.xlu0 %1682, %v381_v36   ;;  %492 = vperm.xlu1 %1683, %v382_v37   ;;  %v1155_v36 = vld [vmem:[%s2276_s6] sm:$0xff] }
  0x55   : > { %482 = vperm.xlu2 %1684, %v380_v39   ;;  %1522 = vmatmul.msk.bf16.gmra.mxu0 %vm635_vm1, %v1636_v42  ;;  %v1157_v39 = vld [vmem:[%s2276_s6 + $0x10] sm:$0xff] }
  0x56   : > { %477 = vperm.xlu1 %1683, %v379_v40   ;;  %412 = vperm.xlu0 %1682, %v366_v41  }
  0x5d   : > { %929 = vperm.xlu2 %1684, %v855_v43  }
  0x5e   : > { %402 = vperm.xlu1 %1683, %v364_v44   ;;  %397 = vperm.xlu0 %1682, %v363_v45   ;;  %v1373_v45 = vld [vmem:[%s2278_s8] sm:$0xff] }
  0x65   : > { %924 = vperm.xlu2 %1684, %v854_v46   ;;  %1523 = vmatmul.msk.bf16.gmra.mxu0 %vm635_vm1, %v1637_v49  ;;  %v1156_v46 = vld [vmem:[%s2276_s6 + $0x8] sm:$0xff] }
  0x66   : > { %919 = vperm.xlu1 %1683, %v853_v47   ;;  %934 = vperm.xlu0 %1682, %v856_v48   ;;  %v1642_v47 = vld [vmem:[%s2271_s1 + $0x50] sm:$0xff] }
  0x67   : > { %v1920_v54 = vpop.permute.xlu2 %537 }
  0x6d   : > { %899 = vperm.xlu2 %1684, %v849_v50  }
  0x6e   : > { %914 = vperm.xlu1 %1683, %v852_v51   ;;  %909 = vperm.xlu0 %1682, %v851_v52  }
  0x6f   : > { %v1941_v61 = vpop.permute.xlu2 %542 }
  0x75   : > { %894 = vperm.xlu2 %1684, %v848_v53   ;;  %1524 = vmatmul.msk.bf16.gmra.mxu0 %vm635_vm1, %v1638_v57 }
  0x76   : > { %889 = vperm.xlu1 %1683, %v847_v55   ;;  %904 = vperm.xlu0 %1682, %v850_v56  }
  0x77   : > { %v1959_v4 = vpop.permute.xlu2 %527 }
  0x7d   : > { %869 = vperm.xlu2 %1684, %v843_v58  }
  0x7e   : > { %884 = vperm.xlu1 %1683, %v846_v59   ;;  %879 = vperm.xlu0 %1682, %v845_v60  }
  0x7f   : > { %v1979_v12 = vpop.permute.xlu2 %452 }
  0x80   : > { %v1943_v62 = vpop.permute.xlu0 %547  ;;  %v1945_v63 = vpop.permute.xlu1 %467 }
  0x85   : > { %864 = vperm.xlu2 %1684, %v842_v0   ;;  %1525 = vmatmul.msk.bf16.gmra.mxu0 %vm635_vm1, %v1639_v3  ;;  %v1643_v3 = vld [vmem:[%s2271_s1 + $0x58] sm:$0xff] }
  0x86   : > { %859 = vperm.xlu1 %1683, %v841_v1   ;;  %874 = vperm.xlu0 %1682, %v844_v2  }
  0x87   : > { %v2003_v21 = vpop.permute.xlu2 %437 }
  0x88   : > { %v1961_v5 = vpop.permute.xlu0 %552  ;;  %v1963_v6 = vpop.permute.xlu1 %472 }
  0x8d   : > { %1233 = vperm.xlu2 %1684, %v1167_v7  }
  0x8e   : > { %1248 = vperm.xlu1 %1683, %v1170_v8   ;;  %1243 = vperm.xlu0 %1682, %v1169_v9  }
  0x8f   : > { %v2031_v32 = vpop.permute.xlu2 %512 }
  0x90   : > { %v1975_v10 = vpop.permute.xlu1 %462  ;;  %v1977_v11 = vpop.permute.xlu0 %457 }
  0x92   : > { %v1993_v17 = vpop.f32.mrf.mxu0 }
  0x95   : > { %1228 = vperm.xlu2 %1684, %v1166_v13   ;;  %1526 = vmatmul.msk.bf16.gmra.mxu0 %vm635_vm1, %v1640_v16 }
  0x96   : > { %1223 = vperm.xlu1 %1683, %v1165_v14   ;;  %1238 = vperm.xlu0 %1682, %v1168_v15  }
  0x97   : > { %v2049_v41 = vpop.permute.xlu2 %497 }
  0x98   : > { %v1995_v18 = vpop.permute.xlu0 %532  ;;  %v1997_v19 = vpop.permute.xlu1 %447 }
  0x9a   : > { %v2011_v24 = vpop.f32.mrf.mxu0  ;;  %v2020_v28 = vpop.f32.mrf.mxu2 }
  0x9d   : > { %1203 = vperm.xlu2 %1684, %v1161_v20  }
  0x9e   : > { %1218 = vperm.xlu1 %1683, %v1164_v22   ;;  %1213 = vperm.xlu0 %1682, %v1163_v23  }
  0x9f   : > { %v423_v51 = vpop.permute.xlu2 %422 }
  0xa0   : > { %v2013_v25 = vpop.permute.xlu0 %517  ;;  %v2015_v26 = vpop.permute.xlu1 %522 }
  0xa2   : > { %v702_v33 = vpop.f32.mrf.mxu0  ;;  %v2041_v37 = vpop.f32.mrf.mxu2 }
  0xa5   : > { %1198 = vperm.xlu2 %1684, %v1160_v27   ;;  %1527 = vmatmul.msk.bf16.gmra.mxu0 %vm635_vm1, %v1641_v31 }
  0xa6   : > { %1193 = vperm.xlu1 %1683, %v1159_v29   ;;  %1208 = vperm.xlu0 %1682, %v1162_v30  }
  0xa7   : > { %v408_v2 = vpop.permute.xlu2 %407 }
  0xa8   : > { %v2033_v34 = vpop.permute.xlu1 %507  ;;  %v2035_v35 = vpop.permute.xlu0 %442  ;;  %v703_v8 = vadd.f32 %v702_v33, %v408_v2 }
  0xaa   : > { %v704_v40 = vpop.f32.mrf.mxu0  ;;  %v762_v44 = vpop.f32.mrf.mxu2  ;;  %v779_v16 = vmax.f32 %v703_v8, 0.0 }
  0xab   : > { %v763_v2 = vadd.f32 %v762_v44, %v1959_v4 }
  0xad   : > { %1173 = vperm.xlu2 %1684, %v1155_v36  }
  0xae   : > { %1188 = vperm.xlu1 %1683, %v1158_v38   ;;  %1183 = vperm.xlu0 %1682, %v1157_v39  }
  0xb0   : > { %v433_v42 = vpop.permute.xlu1 %432  ;;  %v428_v43 = vpop.permute.xlu0 %427 }
  0xb2   : > { %v707_v48 = vpop.f32.mrf.mxu0  ;;  %v764_v52 = vpop.f32.mrf.mxu2 }
  0xb5   : > { %1528 = vmatmul.msk.bf16.gmra.mxu0 %vm635_vm1, %v1642_v47 }
  0xb6   : > { %1376 = vperm.xlu1 %1683, %v1373_v45   ;;  %1178 = vperm.xlu0 %1682, %v1156_v46  }
  0xb8   : > { %v2060_v49 = vpop.permute.xlu0 %502  ;;  %v418_v50 = vpop.permute.xlu1 %417 }
  0xb9   : > { %v708_v53 = vadd.f32 %v707_v48, %v418_v50 }
  0xba   : > { %v709_v55 = vpop.f32.mrf.mxu0  ;;  %v767_v0 = vpop.f32.mrf.mxu2 }
  0xbb   : > { %v710_v56 = vadd.f32 %v709_v55, %v423_v51  ;;  %v781_v57 = vmax.f32 %v708_v53, 0.0  ;;  %v768_v51 = vadd.f32 %v767_v0, %v1920_v54  ;;  %v760_v54 = vadd.f32 %v2041_v37, %v2015_v26 }
  0xbc   : > { %v803_v0 = vmax.f32 %v763_v2, 0.0 }
  0xbd   : > { %v782_v58 = vmax.f32 %v710_v56, 0.0 }
  0xbf   : > { %v2067_v1 = vpack.c.bf16 %v782_v58, %v781_v57  ;;  %v805_v57 = vmax.f32 %v768_v51, 0.0 }
  0xc0   : > { %v2063_v59 = vpop.permute.xlu0 %487  ;;  %v2065_v60 = vpop.permute.xlu1 %492 }
  0xc2   : > { %v712_v7 = vpop.f32.mrf.mxu0  ;;  %v769_v15 = vpop.f32.mrf.mxu2 }
  0xc3   : > { %v713_v22 = vadd.f32 %v712_v7, %v428_v43 }
  0xc5   : > { %1529 = vmatmul.msk.bf16.gmra.mxu0 %vm635_vm1, %v1643_v3  ;;  %v783_v30 = vmax.f32 %v713_v22, 0.0  ;;  %v765_v3 = vadd.f32 %v764_v52, %v1995_v18 }
  0xc7   : > { %v804_v8 = vmax.f32 %v765_v3, 0.0 }
  0xc8   : > { %v2072_v9 = vpop.permute.xlu1 %477  ;;  %v413_v13 = vpop.permute.xlu0 %412 }
  0xc9   : > { %v705_v14 = vadd.f32 %v704_v40, %v413_v13  ;;  %v802_v13 = vmax.f32 %v760_v54, 0.0 }
  0xca   : > { %v714_v23 = vpop.f32.mrf.mxu0  ;;  %v772_v45 = vpop.f32.mrf.mxu2 }
  0xcb   : > { %v780_v20 = vmax.f32 %v705_v14, 0.0  ;;  %v715_v29 = vadd.f32 %v714_v23, %v433_v42  ;;  %v773_v43 = vadd.f32 %v772_v45, %v1943_v62  ;;  %v770_v42 = vadd.f32 %v769_v15, %v1941_v61 }
  0xcc   : > { %v758_v62 = vadd.f32 %v2020_v28, %v2013_v25  ;;  %v838_v15 = vpack.c.bf16 %v804_v8, %v803_v0 }
  0xcd   : > { %v2075_v27 = vpack.c.bf16 %v780_v20, %v779_v16  ;;  %v784_v31 = vmax.f32 %v715_v29, 0.0  ;;  %v807_v55 = vmax.f32 %v773_v43, 0.0 }
  0xcf   : > { %v828_v46 = vpack.c.bf16 %v784_v31, %v783_v30 }
  0xd0   : > { %v403_v36 = vpop.permute.xlu1 %402  ;;  %v398_v38 = vpop.permute.xlu0 %397 }
  0xd1   : > { %v700_v33 = vadd.f32 %v2011_v24, %v403_v36  ;;  %v698_v39 = vadd.f32 %v1993_v17, %v398_v38  ;;  %v806_v17 = vmax.f32 %v770_v42, 0.0 }
  0xd2   : > { %v717_v48 = vpop.f32.mrf.mxu0  ;;  %v774_v53 = vpop.f32.mrf.mxu2 }
  0xd3   : > { %v778_v47 = vmax.f32 %v700_v33, 0.0  ;;  %v777_v40 = vmax.f32 %v698_v39, 0.0  ;;  %v775_v56 = vadd.f32 %v774_v53, %v1961_v5  ;;  %v839_v61 = vpack.c.bf16 %v806_v17, %v805_v57 }
  0xd4   : > { %v801_v5 = vmax.f32 %v758_v62, 0.0 }
  0xd5   : > { %v2079_v50 = vpack.c.bf16 %v778_v47, %v777_v40  ;;  %v808_v58 = vmax.f32 %v775_v56, 0.0 }
  0xd6   : > { %v837_v4 = vpack.c.bf16 %v802_v13, %v801_v5  ;;  %v483_v5 = vpop.permute.xlu2 %482 }
  0xd7   : > { %v840_v7 = vpack.c.bf16 %v808_v58, %v807_v55 }
  0xd9   : > { %1066 = vmatpush.bf16.msrb.mxu2 %v840_v7 }
  0xda   : > { %v719_v24 = vpop.f32.mrf.mxu0 }
  0xdd   : > { %1067 = vmatpush.bf16.msrb.mxu2 %v839_v61 }
  0xe1   : > { %1068 = vmatpush.bf16.msrb.mxu2 %v838_v15 }
  0xe2   : > { %v722_v14 = vpop.f32.mrf.mxu0 }
  0xe3   : > { %v723_v36 = vadd.f32 %v722_v14, %v1997_v19 }
  0xe5   : > { %1069 = vmatpush.bf16.msrb.mxu2 %v837_v4 }
  0xea   : > { %v724_v44 = vpop.f32.mrf.mxu0 }
  0xeb   : > { %v725_v29 = vadd.f32 %v724_v44, %v1979_v12 }
  0xed   : > { %v788_v39 = vmax.f32 %v725_v29, 0.0  ;;  %v1576_v29 = vld [vmem:[%s2273_s3 + $0x50] sm:$0xf] }
  0xf2   : > { %v727_v18 = vpop.f32.mrf.mxu0 }
  0xf3   : > { %v728_v20 = vadd.f32 %v727_v18, %v1977_v11  ;;  %v1648_v18 = vld [vmem:[%s2273_s3 + $0x4] sm:$0xf] }
  0xf5   : > { %v789_v38 = vmax.f32 %v728_v20, 0.0  ;;  %v1546_v20 = vld [vmem:[%s2273_s3 + $0x18] sm:$0xf0] }
  0xfa   : > { %v729_v52 = vpop.f32.mrf.mxu0 }
  0xfb   : > { %v730_v26 = vadd.f32 %v729_v52, %v1975_v10  ;;  %v718_v10 = vadd.f32 %v717_v48, %v2003_v21  ;;  %v1649_v21 = vld [vmem:[%s2273_s3 + $0x4] sm:$0xf0] }
  0xfd   : > { %v790_v30 = vmax.f32 %v730_v26, 0.0  ;;  %v785_v40 = vmax.f32 %v718_v10, 0.0  ;;  %v1657_v26 = vld [vmem:[%s2273_s3 + $0x44] sm:$0xf0]  ;;  %v1562_v10 = vld [vmem:[%s2273_s3 + $0x38] sm:$0xf0] }
  0xff   : > { %v831_v45 = vpack.c.bf16 %v790_v30, %v789_v38  ;;  %v1659_v30 = vld [vmem:[%s2273_s3 + $0x54] sm:$0xf0] }
 0x100   : > { %v1577_v38 = vor.u32 %v1659_v30, %v1576_v29 }
 0x102   : > { %v732_v16 = vpop.f32.mrf.mxu0 }
 0x103   : > { %v733_v25 = vadd.f32 %v732_v16, %v1945_v63  ;;  %v720_v63 = vadd.f32 %v719_v24, %v2035_v35  ;;  %v1536_v35 = vld [vmem:[%s2273_s3] sm:$0xf]  ;;  %v1653_v24 = vld [vmem:[%s2273_s3 + $0x24] sm:$0xf0] }
 0x104   : > { %v1537_v51 = vor.u32 %v1649_v21, %v1536_v35  ;;  %v1658_v21 = vld [vmem:[%s2273_s3 + $0x54] sm:$0xf] }
 0x105   : > { %v791_v22 = vmax.f32 %v733_v25, 0.0  ;;  %v786_v11 = vmax.f32 %v720_v63, 0.0  ;;  %v1584_v63 = vld [vmem:[%s2273_s3 + $0x60] sm:$0xf] }
 0x107   : > { %v829_v43 = vpack.c.bf16 %v786_v11, %v785_v40  ;;  %v1663_v40 = vld [vmem:[%s2273_s3 + $0x74] sm:$0xf0] }
 0x10a   : > { %v734_v28 = vpop.f32.mrf.mxu0 }
 0x10b   : > { %v735_v37 = vadd.f32 %v734_v28, %v1963_v6  ;;  %v787_v6 = vmax.f32 %v723_v36, 0.0  ;;  %v1568_v28 = vld [vmem:[%s2273_s3 + $0x40] sm:$0xf]  ;;  %v1554_v36 = vld [vmem:[%s2273_s3 + $0x28] sm:$0xf0] }
 0x10d   : > { %v792_v23 = vmax.f32 %v735_v37, 0.0  ;;  %v830_v47 = vpack.c.bf16 %v788_v39, %v787_v6  ;;  %v1650_v37 = vld [vmem:[%s2273_s3 + $0x14] sm:$0xf]  ;;  %v1661_v39 = vld [vmem:[%s2273_s3 + $0x64] sm:$0xf0] }
 0x10e   : > { %v1585_v6 = vor.u32 %v1661_v39, %v1584_v63 }
 0x10f   : > { %v832_v31 = vpack.c.bf16 %v792_v23, %v791_v22  ;;  %v1569_v22 = vor.u32 %v1657_v26, %v1568_v28  ;;  %v1549_v23 = vor.u32 %v1650_v37, %v1546_v20 }
 0x111   : > { %1017 = vmatpush.bf16.msra.mxu1 %v832_v31  ;;  %v1652_v31 = vld [vmem:[%s2273_s3 + $0x24] sm:$0xf] }
 0x112   : > { %v737_v33 = vpop.f32.mrf.mxu0 }
 0x115   : > { %1018 = vmatpush.bf16.msra.mxu1 %v831_v45  ;;  %v1654_v45 = vld [vmem:[%s2273_s3 + $0x34] sm:$0xf] }
 0x116   : > { %v1565_v11 = vor.u32 %v1654_v45, %v1562_v10 }
 0x119   : > { %1019 = vmatpush.bf16.msra.mxu1 %v830_v47  ;;  %v1592_v47 = vld [vmem:[%s2273_s3 + $0x70] sm:$0xf] }
 0x11a   : > { %v739_v12 = vpop.f32.mrf.mxu0 }
 0x11b   : > { %v740_v13 = vadd.f32 %v739_v12, %v483_v5  ;;  %v1656_v12 = vld [vmem:[%s2273_s3 + $0x44] sm:$0xf] }
 0x11d   : > { %1020 = vmatpush.bf16.msra.mxu1 %v829_v43  ;;  %v1570_v43 = vld [vmem:[%s2273_s3 + $0x48] sm:$0xf0] }
 0x11e   : > { %v1573_v35 = vor.u32 %v1656_v12, %v1570_v43 }
 0x121   : > { %1021 = vmatpush.bf16.msra.mxu1 %v828_v46 }
 0x122   : > { %v742_v19 = vpop.f32.mrf.mxu0 }
 0x123   : > { %v743_v0 = vadd.f32 %v742_v19, %v2063_v59  ;;  %v1655_v59 = vld [vmem:[%s2273_s3 + $0x34] sm:$0xf0]  ;;  %v1593_v19 = vor.u32 %v1663_v40, %v1592_v47 }
 0x125   : > { %1022 = vmatpush.bf16.msra.mxu1 %v2067_v1  ;;  %v1544_v1 = vld [vmem:[%s2273_s3 + $0x10] sm:$0xf]  ;;  %v795_v15 = vmax.f32 %v743_v0, 0.0 }
 0x129   : > { %1023 = vmatpush.bf16.msra.mxu1 %v2075_v27  ;;  %v1651_v27 = vld [vmem:[%s2273_s3 + $0x14] sm:$0xf0] }
 0x12a   : > { %v744_v48 = vpop.f32.mrf.mxu0  ;;  %v1545_v53 = vor.u32 %v1651_v27, %v1544_v1  ;;  %v2195_v1 = vpop.permute.xlu1 %919  ;;  %v1660_v27 = vld [vmem:[%s2273_s3 + $0x64] sm:$0xf] }
 0x12d   : > { %1024 = vmatpush.bf16.msra.mxu1 %v2079_v50  ;;  %v1552_v50 = vld [vmem:[%s2273_s3 + $0x20] sm:$0xf] }
 0x12e   : > { %v1553_v2 = vor.u32 %v1653_v24, %v1552_v50  ;;  %v1662_v24 = vld [vmem:[%s2273_s3 + $0x74] sm:$0xf] }
 0x130   : > { %1025 = vmatmul.bf16.vlgmr.msra.gmra.mxu1 %v1537_v51 }
 0x132   : > { %v747_v42 = vpop.f32.mrf.mxu0  ;;  %v2205_v50 = vpop.permute.xlu1 %914 }
 0x133   : > { %v748_v3 = vadd.f32 %v747_v42, %v2049_v41  ;;  %v794_v41 = vmax.f32 %v740_v13, 0.0  ;;  %v2193_v42 = vpop.permute.xlu2 %929 }
 0x135   : > { %v797_v8 = vmax.f32 %v748_v3, 0.0 }
 0x13a   : > { %v749_v46 = vpop.f32.mrf.mxu0  ;;  %v890_v3 = vpop.permute.xlu1 %889 }
 0x13b   : > { %v750_v17 = vadd.f32 %v749_v46, %v2060_v49  ;;  %v1586_v46 = vld [vmem:[%s2273_s3 + $0x68] sm:$0xf0] }
 0x13d   : > { %v798_v54 = vmax.f32 %v750_v17, 0.0 }
 0x13f   : > { %v835_v49 = vpack.c.bf16 %v798_v54, %v797_v8 }
 0x140   : > { %1030 = vmatmul.bf16.gmra.mxu1 %v1545_v53  ;;  %v1589_v53 = vor.u32 %v1660_v27, %v1586_v46 }
 0x142   : > { %v752_v55 = vpop.f32.mrf.mxu0  ;;  %v885_v54 = vpop.permute.xlu1 %884 }
 0x143   : > { %v753_v56 = vadd.f32 %v752_v55, %v2033_v34  ;;  %v745_v34 = vadd.f32 %v744_v48, %v2065_v60  ;;  %v1560_v60 = vld [vmem:[%s2273_s3 + $0x30] sm:$0xf]  ;;  %v1578_v48 = vld [vmem:[%s2273_s3 + $0x58] sm:$0xf0]  ;;  %v2203_v55 = vpop.permute.xlu2 %924 }
 0x144   : > { %v1561_v16 = vor.u32 %v1655_v59, %v1560_v60  ;;  %v1581_v51 = vor.u32 %v1658_v21, %v1578_v48 }
 0x145   : > { %v799_v7 = vmax.f32 %v753_v56, 0.0  ;;  %v796_v14 = vmax.f32 %v745_v34, 0.0 }
 0x147   : > { %v834_v4 = vpack.c.bf16 %v796_v14, %v795_v15 }
 0x14a   : > { %v754_v57 = vpop.f32.mrf.mxu0  ;;  %v860_v5 = vpop.permute.xlu1 %859 }
 0x14b   : > { %v755_v58 = vadd.f32 %v754_v57, %v2031_v32  ;;  %v738_v32 = vadd.f32 %v737_v33, %v2072_v9  ;;  %v1538_v9 = vld [vmem:[%s2273_s3 + $0x8] sm:$0xf0]  ;;  %v1557_v33 = vor.u32 %v1652_v31, %v1554_v36  ;;  %v1594_v57 = vld [vmem:[%s2273_s3 + $0x78] sm:$0xf0]  ;;  %v900_v17 = vpop.permute.xlu2 %899 }
 0x14c   : > { %v1541_v25 = vor.u32 %v1648_v18, %v1538_v9 }
 0x14d   : > { %v800_v62 = vmax.f32 %v755_v58, 0.0  ;;  %v793_v44 = vmax.f32 %v738_v32, 0.0 }
 0x14f   : > { %v836_v61 = vpack.c.bf16 %v800_v62, %v799_v7  ;;  %v833_v52 = vpack.c.bf16 %v794_v41, %v793_v44  ;;  %v2213_v7 = vpop.permute.xlu0 %934 }
 0x150   : > { %1035 = vmatmul.bf16.gmra.mxu1 %v1553_v2  ;;  %v1597_v2 = vor.u32 %v1662_v24, %v1594_v57 }
 0x151   : > { %1070 = vmatpush.bf16.msrb.mxu2 %v836_v61 }
 0x153   : > { %v895_v62 = vpop.permute.xlu2 %894 }
 0x155   : > { %1071 = vmatpush.bf16.msrb.mxu2 %v835_v49 }
 0x157   : > { %v2215_v61 = vpop.permute.xlu0 %909 }
 0x159   : > { %1072 = vmatpush.bf16.msrb.mxu2 %v834_v4 }
 0x15b   : > { %v870_v0 = vpop.permute.xlu2 %869 }
 0x15d   : > { %1073 = vmatpush.bf16.msrb.mxu2 %v833_v52 }
 0x15f   : > { %v2217_v32 = vpop.permute.xlu0 %904 }
 0x160   : > { %1040 = vmatmul.bf16.gmra.mxu1 %v1561_v16  ;;  %1074 = vmatmul.bf16.vlgmr.msrb.gmra.mxu2 %v1541_v25 }
 0x163   : > { %v865_v15 = vpop.permute.xlu2 %864 }
 0x167   : > { %v880_v9 = vpop.permute.xlu0 %879 }
 0x16f   : > { %v875_v37 = vpop.permute.xlu0 %874 }
 0x170   : > { %1045 = vmatmul.bf16.gmra.mxu1 %v1569_v22  ;;  %1079 = vmatmul.bf16.gmra.mxu2 %v1549_v23 }
 0x180   : > { %1050 = vmatmul.bf16.gmra.mxu1 %v1577_v38  ;;  %1084 = vmatmul.bf16.gmra.mxu2 %v1557_v33 }
 0x190   : > { %1055 = vmatmul.bf16.gmra.mxu1 %v1585_v6  ;;  %1089 = vmatmul.bf16.gmra.mxu2 %v1565_v11 }
 0x1a0   : > { %1060 = vmatmul.bf16.gmra.mxu1 %v1593_v19  ;;  %1094 = vmatmul.bf16.gmra.mxu2 %v1573_v35 }
 0x1ad   : > { %v1026_v56 = vpop.f32.mrf.mxu1 }
 0x1ae   : > { %v1027_v13 = vadd.f32 %v1026_v56, %v860_v5 }
 0x1b0   : > { %1099 = vmatmul.bf16.gmra.mxu2 %v1581_v51 }
 0x1b5   : > { %v1028_v58 = vpop.f32.mrf.mxu1 }
 0x1b6   : > { %v1029_v4 = vadd.f32 %v1028_v58, %v865_v15 }
 0x1bd   : > { %v1031_v34 = vpop.f32.mrf.mxu1 }
 0x1be   : > { %v1032_v16 = vadd.f32 %v1031_v34, %v870_v0 }
 0x1c0   : > { %1104 = vmatmul.bf16.gmra.mxu2 %v1589_v53 }
 0x1c5   : > { %v1033_v8 = vpop.f32.mrf.mxu1 }
 0x1c6   : > { %v1034_v20 = vadd.f32 %v1033_v8, %v875_v37 }
 0x1cd   : > { %v1036_v41 = vpop.f32.mrf.mxu1 }
 0x1ce   : > { %v1037_v38 = vadd.f32 %v1036_v41, %v880_v9 }
 0x1d0   : > { %1109 = vmatmul.bf16.gmra.mxu2 %v1597_v2 }
 0x1d5   : > { %v1038_v25 = vpop.f32.mrf.mxu1 }
 0x1d6   : > { %v1039_v45 = vadd.f32 %v1038_v25, %v885_v54 }
 0x1dd   : > { %v1041_v29 = vpop.f32.mrf.mxu1 }
 0x1de   : > { %v1042_v43 = vadd.f32 %v1041_v29, %v890_v3 }
 0x1e3   : > { %v1075_v14 = vpop.f32.mrf.mxu2 }
 0x1e4   : > { %v1076_v49 = vadd.f32 %v1075_v14, %v1027_v13 }
 0x1e5   : > { %v1043_v39 = vpop.f32.mrf.mxu1 }
 0x1e6   : > { %v1115_v59 = vmax.f32 %v1076_v49, 0.0  ;;  %v1044_v21 = vadd.f32 %v1043_v39, %v895_v62  ;;  %v1666_v39 = vld [vmem:[%s2275_s5 + $0x10] sm:$0xff] }
 0x1eb   : > { %v1077_v44 = vpop.f32.mrf.mxu2 }
 0x1ec   : > { %v1078_v60 = vadd.f32 %v1077_v44, %v1029_v4 }
 0x1ed   : > { %v1046_v12 = vpop.f32.mrf.mxu1 }
 0x1ee   : > { %v1116_v18 = vmax.f32 %v1078_v60, 0.0  ;;  %v1047_v24 = vadd.f32 %v1046_v12, %v900_v17  ;;  %v1671_v12 = vld [vmem:[%s2275_s5 + $0x38] sm:$0xff] }
 0x1f0   : > { %v2219_v52 = vpack.c.bf16 %v1116_v18, %v1115_v59 }
 0x1f3   : > { %v1080_v28 = vpop.f32.mrf.mxu2 }
 0x1f4   : > { %v1081_v26 = vadd.f32 %v1080_v28, %v1032_v16 }
 0x1f5   : > { %v1048_v48 = vpop.f32.mrf.mxu1 }
 0x1f6   : > { %v1117_v30 = vmax.f32 %v1081_v26, 0.0 }
 0x1fb   : > { %v1082_v22 = vpop.f32.mrf.mxu2 }
 0x1fc   : > { %v1083_v23 = vadd.f32 %v1082_v22, %v1034_v20 }
 0x1fd   : > { %v1051_v2 = vpop.f32.mrf.mxu1 }
 0x1fe   : > { %v1118_v31 = vmax.f32 %v1083_v23, 0.0  ;;  %v1052_v37 = vadd.f32 %v1051_v2, %v2215_v61  ;;  %v1664_v61 = vld [vmem:[%s2275_s5] sm:$0xff] }
 0x200   : > { %v2221_v36 = vpack.c.bf16 %v1118_v31, %v1117_v30 }
 0x203   : > { %v1085_v33 = vpop.f32.mrf.mxu2 }
 0x204   : > { %v1086_v63 = vadd.f32 %v1085_v33, %v1037_v38 }
 0x205   : > { %v1053_v54 = vpop.f32.mrf.mxu1 }
 0x206   : > { %v1119_v11 = vmax.f32 %v1086_v63, 0.0  ;;  %v1054_v16 = vadd.f32 %v1053_v54, %v2205_v50 }
 0x20b   : > { %v1087_v10 = vpop.f32.mrf.mxu2 }
 0x20c   : > { %v1088_v6 = vadd.f32 %v1087_v10, %v1039_v45  ;;  %v1669_v45 = vld [vmem:[%s2275_s5 + $0x28] sm:$0xff]  ;;  %v1244_v10 = vpop.permute.xlu0 %1243 }
 0x20d   : > { %v1056_v8 = vpop.f32.mrf.mxu1 }
 0x20e   : > { %v1120_v47 = vmax.f32 %v1088_v6, 0.0  ;;  %v1057_v59 = vadd.f32 %v1056_v8, %v2195_v1  ;;  %v1670_v6 = vld [vmem:[%s2275_s5 + $0x30] sm:$0xff] }
 0x210   : > { %v1149_v40 = vpack.c.bf16 %v1120_v47, %v1119_v11  ;;  %v1234_v11 = vpop.permute.xlu2 %1233 }
 0x213   : > { %v1090_v19 = vpop.f32.mrf.mxu2 }
 0x214   : > { %v1091_v35 = vadd.f32 %v1090_v19, %v1042_v43  ;;  %v1239_v47 = vpop.permute.xlu0 %1238  ;;  %v1249_v19 = vpop.permute.xlu1 %1248 }
 0x215   : > { %v1058_v13 = vpop.f32.mrf.mxu1 }
 0x216   : > { %v1121_v46 = vmax.f32 %v1091_v35, 0.0  ;;  %v1059_v4 = vadd.f32 %v1058_v13, %v2203_v55  ;;  %v1049_v55 = vadd.f32 %v1048_v48, %v2217_v32  ;;  %v1665_v32 = vld [vmem:[%s2275_s5 + $0x8] sm:$0xff] }
 0x21b   : > { %v1092_v51 = vpop.f32.mrf.mxu2 }
 0x21c   : > { %v1093_v27 = vadd.f32 %v1092_v51, %v1044_v21  ;;  %v2256_v43 = vpop.permute.xlu0 %1213  ;;  %v1224_v48 = vpop.permute.xlu1 %1223 }
 0x21d   : > { %v1061_v49 = vpop.f32.mrf.mxu1 }
 0x21e   : > { %v1122_v53 = vmax.f32 %v1093_v27, 0.0  ;;  %v1062_v41 = vadd.f32 %v1061_v49, %v2193_v42 }
 0x220   : > { %v1150_v56 = vpack.c.bf16 %v1122_v53, %v1121_v46 }
 0x223   : > { %v1095_v57 = vpop.f32.mrf.mxu2 }
 0x224   : > { %v1096_v58 = vadd.f32 %v1095_v57, %v1047_v24  ;;  %v1209_v21 = vpop.permute.xlu0 %1208  ;;  %v1219_v53 = vpop.permute.xlu1 %1218 }
 0x225   : > { %v1063_v15 = vpop.f32.mrf.mxu1 }
 0x226   : > { %v1064_v17 = vadd.f32 %v1063_v15, %v2213_v7  ;;  %v1123_v33 = vmax.f32 %v1096_v58, 0.0 }
 0x22b   : > { %v1097_v34 = vpop.f32.mrf.mxu2 }
 0x22c   : > { %v1098_v29 = vadd.f32 %v1097_v34, %v1049_v55  ;;  %v1184_v27 = vpop.permute.xlu0 %1183  ;;  %v1194_v8 = vpop.permute.xlu1 %1193 }
 0x22e   : > { %v1124_v38 = vmax.f32 %v1098_v29, 0.0 }
 0x230   : > { %v1151_v63 = vpack.c.bf16 %v1124_v38, %v1123_v33 }
 0x233   : > { %v1100_v0 = vpop.f32.mrf.mxu2 }
 0x234   : > { %v1101_v23 = vadd.f32 %v1100_v0, %v1052_v37  ;;  %v1179_v57 = vpop.permute.xlu0 %1178 }
 0x236   : > { %v1125_v31 = vmax.f32 %v1101_v23, 0.0 }
 0x23b   : > { %v1102_v5 = vpop.f32.mrf.mxu2 }
 0x23c   : > { %v1103_v20 = vadd.f32 %v1102_v5, %v1054_v16 }
 0x23e   : > { %v1126_v30 = vmax.f32 %v1103_v20, 0.0 }
 0x240   : > { %v1152_v50 = vpack.c.bf16 %v1126_v30, %v1125_v31 }
 0x243   : > { %v1105_v3 = vpop.f32.mrf.mxu2 }
 0x244   : > { %v1106_v25 = vadd.f32 %v1105_v3, %v1057_v59  ;;  %v1189_v3 = vpop.permute.xlu1 %1188 }
 0x246   : > { %v1127_v7 = vmax.f32 %v1106_v25, 0.0 }
 0x24b   : > { %v1107_v14 = vpop.f32.mrf.mxu2 }
 0x24c   : > { %v1108_v18 = vadd.f32 %v1107_v14, %v1059_v4 }
 0x24e   : > { %v1128_v22 = vmax.f32 %v1108_v18, 0.0 }
 0x250   : > { %v1153_v1 = vpack.c.bf16 %v1128_v22, %v1127_v7 }
 0x253   : > { %v1110_v62 = vpop.f32.mrf.mxu2 }
 0x254   : > { %v1111_v44 = vadd.f32 %v1110_v62, %v1062_v41 }
 0x256   : > { %v1129_v28 = vmax.f32 %v1111_v44, 0.0 }
 0x25b   : > { %v1112_v60 = vpop.f32.mrf.mxu2 }
 0x25c   : > { %v1113_v9 = vadd.f32 %v1112_v60, %v1064_v17 }
 0x25e   : > { %v1130_v26 = vmax.f32 %v1113_v9, 0.0 }
 0x260   : > { %v1154_v42 = vpack.c.bf16 %v1130_v26, %v1129_v28 }
 0x262   : > { %1299 = vmatpush.bf16.msra.mxu3 %v1154_v42 }
 0x266   : > { %1300 = vmatpush.bf16.msra.mxu3 %v1153_v1 }
 0x26a   : > { %1301 = vmatpush.bf16.msra.mxu3 %v1152_v50 }
 0x26e   : > { %1302 = vmatpush.bf16.msra.mxu3 %v1151_v63 }
 0x272   : > { %1303 = vmatpush.bf16.msra.mxu3 %v1150_v56 }
 0x276   : > { %1304 = vmatpush.bf16.msra.mxu3 %v1149_v40  ;;  %v1229_v40 = vpop.permute.xlu2 %1228 }
 0x27a   : > { %1305 = vmatpush.bf16.msra.mxu3 %v2221_v36  ;;  %v1667_v36 = vld [vmem:[%s2275_s5 + $0x18] sm:$0xff] }
 0x27e   : > { %1306 = vmatpush.bf16.msra.mxu3 %v2219_v52  ;;  %v1668_v52 = vld [vmem:[%s2275_s5 + $0x20] sm:$0xff]  ;;  %v1204_v35 = vpop.permute.xlu2 %1203 }
 0x281   : > { %1307 = vmatmul.bf16.vlgmr.msra.gmra.mxu3 %v1664_v61 }
 0x286   : > { %v1199_v51 = vpop.permute.xlu2 %1198 }
 0x28e   : > { %v1174_v56 = vpop.permute.xlu2 %1173 }
 0x291   : > { %1312 = vmatmul.bf16.gmra.mxu3 %v1665_v32 }
 0x2a1   : > { %1317 = vmatmul.bf16.gmra.mxu3 %v1666_v39 }
 0x2b1   : > { %1322 = vmatmul.bf16.gmra.mxu3 %v1667_v36 }
 0x2c1   : > { %1327 = vmatmul.bf16.gmra.mxu3 %v1668_v52 }
 0x2d1   : > { %1332 = vmatmul.bf16.gmra.mxu3 %v1669_v45 }
 0x2e1   : > { %1337 = vmatmul.bf16.gmra.mxu3 %v1670_v6 }
 0x2f1   : > { %1342 = vmatmul.bf16.gmra.mxu3 %v1671_v12 }
 0x304   : > { %v1308_v46 = vpop.f32.mrf.mxu3 }
 0x305   : > { %v1309_v24 = vadd.f32 %v1308_v46, %v1174_v56 }
 0x307   : > { %v1348_v34 = vmax.f32 %v1309_v24, 0.0 }
 0x30c   : > { %v1310_v58 = vpop.f32.mrf.mxu3 }
 0x30d   : > { %v1311_v2 = vadd.f32 %v1310_v58, %v1179_v57 }
 0x30f   : > { %v1349_v54 = vmax.f32 %v1311_v2, 0.0 }
 0x311   : > { %v1365_v0 = vpack.c.bf16 %v1349_v54, %v1348_v34 }
 0x314   : > { %v1313_v5 = vpop.f32.mrf.mxu3 }
 0x315   : > { %v1314_v13 = vadd.f32 %v1313_v5, %v1184_v27 }
 0x317   : > { %v1350_v62 = vmax.f32 %v1314_v13, 0.0 }
 0x31c   : > { %v1315_v14 = vpop.f32.mrf.mxu3 }
 0x31d   : > { %v1316_v49 = vadd.f32 %v1315_v14, %v1189_v3 }
 0x31f   : > { %v1351_v15 = vmax.f32 %v1316_v49, 0.0 }
 0x321   : > { %v1366_v41 = vpack.c.bf16 %v1351_v15, %v1350_v62 }
 0x324   : > { %v1318_v4 = vpop.f32.mrf.mxu3 }
 0x325   : > { %v1319_v17 = vadd.f32 %v1318_v4, %v1194_v8 }
 0x327   : > { %v1352_v59 = vmax.f32 %v1319_v17, 0.0 }
 0x32c   : > { %v1320_v44 = vpop.f32.mrf.mxu3 }
 0x32d   : > { %v1321_v60 = vadd.f32 %v1320_v44, %v1199_v51 }
 0x32f   : > { %v1353_v18 = vmax.f32 %v1321_v60, 0.0 }
 0x331   : > { %v1367_v9 = vpack.c.bf16 %v1353_v18, %v1352_v59 }
 0x334   : > { %v1323_v16 = vpop.f32.mrf.mxu3 }
 0x335   : > { %v1324_v25 = vadd.f32 %v1323_v16, %v1204_v35 }
 0x337   : > { %v1354_v37 = vmax.f32 %v1324_v25, 0.0 }
 0x33c   : > { %v1325_v28 = vpop.f32.mrf.mxu3 }
 0x33d   : > { %v1326_v26 = vadd.f32 %v1325_v28, %v1209_v21 }
 0x33f   : > { %v1355_v20 = vmax.f32 %v1326_v26, 0.0 }
 0x341   : > { %v1368_v22 = vpack.c.bf16 %v1355_v20, %v1354_v37 }
 0x344   : > { %v1328_v42 = vpop.f32.mrf.mxu3 }
 0x345   : > { %v1329_v51 = vadd.f32 %v1328_v42, %v2256_v43 }
 0x34c   : > { %v1330_v55 = vpop.f32.mrf.mxu3 }
 0x34d   : > { %v1331_v12 = vadd.f32 %v1330_v55, %v1219_v53 }
 0x354   : > { %v1333_v23 = vpop.f32.mrf.mxu3 }
 0x355   : > { %v1334_v45 = vadd.f32 %v1333_v23, %v1224_v48  ;;  %v1377_v48 = vpop.permute.xlu1 %1376 }
 0x357   : > { %v1358_v27 = vmax.f32 %v1334_v45, 0.0 }
 0x35c   : > { %v1335_v7 = vpop.f32.mrf.mxu3 }
 0x35d   : > { %v1336_v39 = vadd.f32 %v1335_v7, %v1229_v40  ;;  %v1364_v40 = vld [vmem:[%s2277_s7] sm:$0xf] }
 0x35f   : > { %v1359_v35 = vmax.f32 %v1336_v39, 0.0 }
 0x364   : > { %v1338_v29 = vpop.f32.mrf.mxu3 }
 0x365   : > { %v1339_v63 = vadd.f32 %v1338_v29, %v1234_v11 }
 0x367   : > { %v1360_v6 = vmax.f32 %v1339_v63, 0.0 }
 0x36c   : > { %v1340_v30 = vpop.f32.mrf.mxu3 }
 0x36d   : > { %v1341_v50 = vadd.f32 %v1340_v30, %v1239_v47  ;;  %v1370_v47 = vpack.c.bf16 %v1359_v35, %v1358_v27 }
 0x36f   : > { %v1361_v36 = vmax.f32 %v1341_v50, 0.0 }
 0x371   : > { %v1371_v21 = vpack.c.bf16 %v1361_v36, %v1360_v6 }
 0x374   : > { %v1343_v1 = vpop.f32.mrf.mxu3 }
 0x375   : > { %v1344_v31 = vadd.f32 %v1343_v1, %v1244_v10  ;;  %v1357_v10 = vmax.f32 %v1331_v12, 0.0 }
 0x377   : > { %v1362_v61 = vmax.f32 %v1344_v31, 0.0 }
 0x37c   : > { %v1345_v38 = vpop.f32.mrf.mxu3 }
 0x37d   : > { %v1346_v33 = vadd.f32 %v1345_v38, %v1249_v19  ;;  %v1356_v19 = vmax.f32 %v1329_v51, 0.0 }
 0x37f   : > { %v1363_v32 = vmax.f32 %v1346_v33, 0.0  ;;  %v1369_v11 = vpack.c.bf16 %v1357_v10, %v1356_v19 }
 0x381   : > { %v1372_v52 = vpack.c.bf16 %v1363_v32, %v1362_v61 }
 0x383   : > { %1379 = vmatpush.bf16.msrb.mxu1 %v1372_v52 }
 0x387   : > { %1380 = vmatpush.bf16.msrb.mxu1 %v1371_v21 }
 0x38b   : > { %1381 = vmatpush.bf16.msrb.mxu1 %v1370_v47 }
 0x38f   : > { %1382 = vmatpush.bf16.msrb.mxu1 %v1369_v11 }
 0x393   : > { %1383 = vmatpush.bf16.msrb.mxu1 %v1368_v22 }
 0x397   : > { %1384 = vmatpush.bf16.msrb.mxu1 %v1367_v9 }
 0x39b   : > { %1385 = vmatpush.bf16.msrb.mxu1 %v1366_v41 }
 0x39f   : > { %1386 = vmatpush.bf16.msrb.mxu1 %v1365_v0 }
 0x3a2   : > { %1387 = vmatmul.bf16.vlgmr.msrb.gmra.mxu1 %v1364_v40 }
 0x41f   : > { %v1388_v43 = vpop.f32.mrf.mxu1 }
 0x420   : > { %v1389_v46 = vadd.f32 %v1388_v43, %v1377_v48 }
 0x422   : > { %v1392_v53 = vmax.f32 %v1389_v46, 0.0 }
 0x424   : > { %1393 = vst [vmem:[%s327_s27] sm:$0xff] %v1392_v53 }
 0x427   : > { %v1390_v56 = vpop.f32.mrf.mxu1 }
 0x428 PF: > { %s19_s30 = sadd.s32 1, %s1691_s30  }
 0x429   : > { %p16_p4 = scmp.ge.s32.totalorder %s19_s30, 4  }
 0x42b   :  { %18 = sbr.rel (!%p16_p4) target bundleno = 1 (0x1), region = 86 }

</bundles_post_ra>
